<compile_context>
chip_gen: v5e
topology: v5e:2x2
jax: 0.10.0
libtpu: 0.0.40
codegen_flags: <defaults>
</compile_context>

<pallas_src>
import functools
import math

import jax
import jax.numpy as jnp
from jax.experimental import pallas as pl
from jax.experimental.pallas import tpu as pltpu

_LN_EPS = 1e-5


def _round_up(x, m):
    return (x + m - 1) // m * m


def _gelu_tanh(x):
    # TODO(synk): F.gelu default is the exact erf form; erf has no guaranteed Mosaic
    # lowering, so the tanh approximation (max abs err ~3e-4) is used in-kernel.
    c = math.sqrt(2.0 / math.pi)
    return 0.5 * x * (1.0 + jnp.tanh(c * (x + 0.044715 * x * x * x)))


# ----------------------------------------------------------------------------
# Kernel 1: fused LayerNorm + Linear (x -> LN(x) @ W + b)
# ----------------------------------------------------------------------------
def _ln_matmul_bias_kernel(x_ref, g_ref, b_ref, w_ref, bias_ref, o_ref, *, eps):
    x = x_ref[...]                                        # (bm, E) f32
    mean = jnp.mean(x, axis=1, keepdims=True)
    xc = x - mean
    var = jnp.mean(xc * xc, axis=1, keepdims=True)
    y = xc * jax.lax.rsqrt(var + eps) * g_ref[...] + b_ref[...]
    o_ref[...] = (
        jnp.dot(y, w_ref[...], preferred_element_type=jnp.float32) + bias_ref[...]
    ).astype(o_ref.dtype)


def ln_matmul_bias(x, gamma, beta, w, b, *, block_rows=512):
    N, E = x.shape
    dout = w.shape[1]
    bm = min(block_rows, _round_up(N, 8))
    n_pad = _round_up(N, bm)
    if n_pad != N:
        x = jnp.pad(x, ((0, n_pad - N), (0, 0)))
    out = pl.pallas_call(
        functools.partial(_ln_matmul_bias_kernel, eps=_LN_EPS),
        out_shape=jax.ShapeDtypeStruct((n_pad, dout), jnp.float32),
        grid=(n_pad // bm,),
        in_specs=[
            pl.BlockSpec((bm, E), lambda i: (i, 0)),
            pl.BlockSpec((1, E), lambda i: (0, 0)),
            pl.BlockSpec((1, E), lambda i: (0, 0)),
            pl.BlockSpec((E, dout), lambda i: (0, 0)),
            pl.BlockSpec((1, dout), lambda i: (0, 0)),
        ],
        out_specs=pl.BlockSpec((bm, dout), lambda i: (i, 0)),
        compiler_params=pltpu.CompilerParams(dimension_semantics=("parallel",)),
    )(x, gamma.reshape(1, E), beta.reshape(1, E), w, b.reshape(1, dout))
    return out[:N]


# ----------------------------------------------------------------------------
# Kernel 2: multi-head attention for one batch element (all heads in-kernel)
# ----------------------------------------------------------------------------
def _attention_kernel(q_ref, kv_ref, o_ref, *, nhead, head_dim, scale):
    E = nhead * head_dim
    q = q_ref[0]                         # (S, E)
    kv = kv_ref[0]                       # (Skv, 2E)
    k = kv[:, 0:E]                       # (Skv, E)
    v = kv[:, E:2 * E]                   # (Skv, E)
    outs = []
    for h in range(nhead):               # unrolled; nhead is small and static
        lo = h * head_dim
        hi = lo + head_dim
        qh = q[:, lo:hi] * scale                                  # (S, hd)
        s = jax.lax.dot_general(                                  # q_h @ k_h.T
            qh, k[:, lo:hi], (((1,), (1,)), ((), ())),
            preferred_element_type=jnp.float32)                   # (S, Skv)
        m = jnp.max(s, axis=-1, keepdims=True)
        p = jnp.exp(s - m)
        p = p / jnp.sum(p, axis=-1, keepdims=True)
        outs.append(jnp.dot(p, v[:, lo:hi], preferred_element_type=jnp.float32))
    # single lane-dense store of the concatenated heads
    o_ref[0] = jnp.concatenate(outs, axis=-1).astype(o_ref.dtype)


def mha_attention(q, kv, *, nhead):
    # TODO(synk): whole-sequence attention per batch element; for long sequences this
    # should be tiled flash-style over the key axis with an online softmax.
    B, S, E = q.shape
    _, Skv, E2 = kv.shape
    assert E2 == 2 * E and E % nhead == 0
    head_dim = E // nhead
    scale = 1.0 / math.sqrt(head_dim)
    return pl.pallas_call(
        functools.partial(_attention_kernel, nhead=nhead, head_dim=head_dim,
                          scale=scale),
        out_shape=jax.ShapeDtypeStruct((B, S, E), jnp.float32),
        grid=(B,),
        in_specs=[
            pl.BlockSpec((1, S, E), lambda b: (b, 0, 0)),
            pl.BlockSpec((1, Skv, 2 * E), lambda b: (b, 0, 0)),
        ],
        out_specs=pl.BlockSpec((1, S, E), lambda b: (b, 0, 0)),
        compiler_params=pltpu.CompilerParams(dimension_semantics=("parallel",)),
    )(q, kv)


# ----------------------------------------------------------------------------
# Kernel 3: fused epilogue
#   x = tgt + attn @ Wo + bo ;  out = x + gelu(LN2(x) @ W1 + b1) @ W2 + b2
# ----------------------------------------------------------------------------
def _attn_mlp_epilogue_kernel(a_ref, res_ref, wo_ref, bo_ref, g_ref, b_ref,
                              w1_ref, b1_ref, w2_ref, b2_ref, o_ref, *, eps):
    # attention out-projection + residual 1
    x = (res_ref[...]
         + jnp.dot(a_ref[...], wo_ref[...], preferred_element_type=jnp.float32)
         + bo_ref[...])
    # norm2
    mean = jnp.mean(x, axis=1, keepdims=True)
    xc = x - mean
    var = jnp.mean(xc * xc, axis=1, keepdims=True)
    y = xc * jax.lax.rsqrt(var + eps) * g_ref[...] + b_ref[...]
    # feed-forward + residual 2 (the (bm, dim_mlp) hidden never leaves VMEM)
    h = _gelu_tanh(
        jnp.dot(y, w1_ref[...], preferred_element_type=jnp.float32) + b1_ref[...])
    o_ref[...] = (x
                  + jnp.dot(h, w2_ref[...], preferred_element_type=jnp.float32)
                  + b2_ref[...]).astype(o_ref.dtype)


def attn_mlp_epilogue(attn, tgt, wo, bo, gamma, beta, w1, b1, w2, b2,
                      *, block_rows=512):
    N, E = attn.shape
    dim_mlp = w1.shape[1]
    bm = min(block_rows, _round_up(N, 8))
    n_pad = _round_up(N, bm)
    if n_pad != N:
        pad = ((0, n_pad - N), (0, 0))
        attn = jnp.pad(attn, pad)
        tgt = jnp.pad(tgt, pad)
    out = pl.pallas_call(
        functools.partial(_attn_mlp_epilogue_kernel, eps=_LN_EPS),
        out_shape=jax.ShapeDtypeStruct((n_pad, E), jnp.float32),
        grid=(n_pad // bm,),
        in_specs=[
            pl.BlockSpec((bm, E), lambda i: (i, 0)),        # attention output
            pl.BlockSpec((bm, E), lambda i: (i, 0)),        # residual (tgt)
            pl.BlockSpec((E, E), lambda i: (0, 0)),         # Wo
            pl.BlockSpec((1, E), lambda i: (0, 0)),         # bo
            pl.BlockSpec((1, E), lambda i: (0, 0)),         # ln2 gamma
            pl.BlockSpec((1, E), lambda i: (0, 0)),         # ln2 beta
            pl.BlockSpec((E, dim_mlp), lambda i: (0, 0)),   # W1
            pl.BlockSpec((1, dim_mlp), lambda i: (0, 0)),   # b1
            pl.BlockSpec((dim_mlp, E), lambda i: (0, 0)),   # W2
            pl.BlockSpec((1, E), lambda i: (0, 0)),         # b2
        ],
        out_specs=pl.BlockSpec((bm, E), lambda i: (i, 0)),
        compiler_params=pltpu.CompilerParams(dimension_semantics=("parallel",)),
    )(attn, tgt, wo, bo.reshape(1, E), gamma.reshape(1, E), beta.reshape(1, E),
      w1, b1.reshape(1, dim_mlp), w2, b2.reshape(1, E))
    return out[:N]


# ----------------------------------------------------------------------------
# TransformerCALayer forward (JAX glue around the Pallas kernels)
# ----------------------------------------------------------------------------
def transformer_ca_layer_forward(params, tgt, tgt1, query_pos=None, *, nhead=8):
    # TODO(synk): query_pos is ignored — the reference forward never calls with_pos_embed.
    # TODO(synk): Dropout layers are identity (p=0.0 default / eval); no RNG emitted.
    B, S, E = tgt.shape
    _, Skv, _ = tgt1.shape

    q = ln_matmul_bias(tgt.reshape(B * S, E), params["ln1_g"], params["ln1_b"],
                       params["wq"], params["bq"])                       # (B*S, E)
    kv = ln_matmul_bias(tgt1.reshape(B * Skv, E), params["ln1_g"], params["ln1_b"],
                        params["wkv"], params["bkv"])                    # (B*Skv, 2E)

    attn = mha_attention(q.reshape(B, S, E), kv.reshape(B, Skv, 2 * E), nhead=nhead)

    out = attn_mlp_epilogue(attn.reshape(B * S, E), tgt.reshape(B * S, E),
                            params["wo"], params["bo"],
                            params["ln2_g"], params["ln2_b"],
                            params["w1"], params["b1"],
                            params["w2"], params["b2"])
    return out.reshape(B, S, E)


def init_params(key, embed_dim, nhead, dim_mlp):
    E = embed_dim
    ks = jax.random.split(key, 8)
    s = 0.05
    in_proj_w = jax.random.normal(ks[0], (3 * E, E), jnp.float32) * s
    in_proj_b = jax.random.normal(ks[1], (3 * E,), jnp.float32) * s
    out_w = jax.random.normal(ks[2], (E, E), jnp.float32) * s
    out_b = jax.random.normal(ks[3], (E,), jnp.float32) * s
    lin1_w = jax.random.normal(ks[4], (dim_mlp, E), jnp.float32) * s
    lin1_b = jax.random.normal(ks[5], (dim_mlp,), jnp.float32) * s
    lin2_w = jax.random.normal(ks[6], (E, dim_mlp), jnp.float32) * s
    lin2_b = jax.random.normal(ks[7], (E,), jnp.float32) * s
    return dict(
        # weights pre-transposed to (in, out) so kernels compute x @ W
        wq=in_proj_w[:E].T, bq=in_proj_b[:E],
        wkv=in_proj_w[E:].T, bkv=in_proj_b[E:],            # (E, 2E), (2E,): [K | V]
        wo=out_w.T, bo=out_b,
        w1=lin1_w.T, b1=lin1_b,                            # (E, dim_mlp)
        w2=lin2_w.T, b2=lin2_b,                            # (dim_mlp, E)
        ln1_g=jnp.ones((E,), jnp.float32), ln1_b=jnp.zeros((E,), jnp.float32),
        ln2_g=jnp.ones((E,), jnp.float32), ln2_b=jnp.zeros((E,), jnp.float32),
    )


# ----------------------------------------------------------------------------
# Pure-JAX reference (same math) for a self-check
# ----------------------------------------------------------------------------
def _reference_forward(params, tgt, tgt1, *, nhead):
    E = tgt.shape[-1]
    hd = E // nhead

    def ln(x, g, b, eps=_LN_EPS):
        m = jnp.mean(x, -1, keepdims=True)
        v = jnp.mean((x - m) ** 2, -1, keepdims=True)
        return (x - m) * jax.lax.rsqrt(v + eps) * g + b

    q = ln(tgt, params["ln1_g"], params["ln1_b"]) @ params["wq"] + params["bq"]
    kv = ln(tgt1, params["ln1_g"], params["ln1_b"]) @ params["wkv"] + params["bkv"]
    k, v = kv[..., :E], kv[..., E:]
    B, S, _ = q.shape
    Skv = k.shape[1]
    qh = q.reshape(B, S, nhead, hd).transpose(0, 2, 1, 3)
    kh = k.reshape(B, Skv, nhead, hd).transpose(0, 2, 1, 3)
    vh = v.reshape(B, Skv, nhead, hd).transpose(0, 2, 1, 3)
    s = jnp.einsum("bhqd,bhkd->bhqk", qh, kh) * (1.0 / math.sqrt(hd))
    p = jax.nn.softmax(s, axis=-1)
    o = jnp.einsum("bhqk,bhkd->bhqd", p, vh).transpose(0, 2, 1, 3).reshape(B, S, E)
    x = tgt + o @ params["wo"] + params["bo"]
    h = _gelu_tanh(ln(x, params["ln2_g"], params["ln2_b"]) @ params["w1"] + params["b1"])
    return x + h @ params["w2"] + params["b2"]


if __name__ == "__main__":
    embed_dim, nhead, dim_mlp = 64, 8, 128
    B, S, Skv = 2, 8, 10

    key = jax.random.PRNGKey(0)
    kp, kt, km, kq = jax.random.split(key, 4)
    params = init_params(kp, embed_dim, nhead, dim_mlp)
    tgt = jax.random.normal(kt, (B, S, embed_dim), jnp.float32)
    tgt1 = jax.random.normal(km, (B, Skv, embed_dim), jnp.float32)
    query_pos = jax.random.normal(kq, (B, S, embed_dim), jnp.float32)  # unused in forward

    out = transformer_ca_layer_forward(params, tgt, tgt1, query_pos, nhead=nhead)
    jax.block_until_ready(out)

    assert out.shape == (B, S, embed_dim)
    assert bool(jnp.all(jnp.isfinite(out)))

    with jax.default_matmul_precision("highest"):
        ref = _reference_forward(params, tgt, tgt1, nhead=nhead)
    max_err = float(jnp.max(jnp.abs(out - ref)))
    assert max_err < 2e-3, f"mismatch vs reference: {max_err}"

    print("KERNEL_OK")
</pallas_src>

<mosaic_0001>
module attributes {stable_mosaic.version = 11 : i64} {
  func.func @_ln_matmul_bias_kernel(%arg0: i32, %arg1: memref<16x64xf32, #tpu.memory_space<vmem>>, %arg2: memref<1x64xf32, #tpu.memory_space<vmem>>, %arg3: memref<1x64xf32, #tpu.memory_space<vmem>>, %arg4: memref<64x64xf32, #tpu.memory_space<vmem>>, %arg5: memref<1x64xf32, #tpu.memory_space<vmem>>, %arg6: memref<16x64xf32, #tpu.memory_space<vmem>>) attributes {dimension_semantics = [#tpu.dimension_semantics<parallel>], iteration_bounds = array<i64: 1>, scalar_prefetch = 0 : i64, scratch_operands = 0 : i64, tpu.core_type = #tpu.core_type<tc>, window_params = [{transform_indices = @transform_0, window_bounds = array<i64: 16, 64>}, {pipeline_mode = #tpu.pipeline_mode<synchronous>, transform_indices = @transform_1, window_bounds = array<i64: 1, 64>}, {pipeline_mode = #tpu.pipeline_mode<synchronous>, transform_indices = @transform_2, window_bounds = array<i64: 1, 64>}, {pipeline_mode = #tpu.pipeline_mode<synchronous>, transform_indices = @transform_3, window_bounds = array<i64: 64, 64>}, {pipeline_mode = #tpu.pipeline_mode<synchronous>, transform_indices = @transform_4, window_bounds = array<i64: 1, 64>}, {transform_indices = @transform_5, window_bounds = array<i64: 16, 64>}]} {
    %c0 = arith.constant 0 : index
    %c0_0 = arith.constant 0 : index
    %0 = vector.load %arg1[%c0, %c0_0] : memref<16x64xf32, #tpu.memory_space<vmem>>, vector<16x64xf32>
    %cst = arith.constant dense<0.000000e+00> : vector<16xf32>
    %1 = vector.multi_reduction <add>, %0, %cst [1] : vector<16x64xf32> to vector<16xf32>
    %2 = vector.shape_cast %1 : vector<16xf32> to vector<16x1xf32>
    %cst_1 = arith.constant 6.400000e+01 : f32
    %3 = vector.broadcast %cst_1 : f32 to vector<16x1xf32>
    %4 = arith.divf %2, %3 : vector<16x1xf32>
    %5 = vector.broadcast %4 : vector<16x1xf32> to vector<16x64xf32>
    %6 = arith.subf %0, %5 : vector<16x64xf32>
    %7 = arith.mulf %6, %6 : vector<16x64xf32>
    %cst_2 = arith.constant dense<0.000000e+00> : vector<16xf32>
    %8 = vector.multi_reduction <add>, %7, %cst_2 [1] : vector<16x64xf32> to vector<16xf32>
    %9 = vector.shape_cast %8 : vector<16xf32> to vector<16x1xf32>
    %cst_3 = arith.constant 6.400000e+01 : f32
    %10 = vector.broadcast %cst_3 : f32 to vector<16x1xf32>
    %11 = arith.divf %9, %10 : vector<16x1xf32>
    %cst_4 = arith.constant 9.99999974E-6 : f32
    %12 = vector.broadcast %cst_4 : f32 to vector<16x1xf32>
    %13 = arith.addf %11, %12 : vector<16x1xf32>
    %14 = math.rsqrt %13 : vector<16x1xf32>
    %15 = vector.broadcast %14 : vector<16x1xf32> to vector<16x64xf32>
    %16 = arith.mulf %6, %15 : vector<16x64xf32>
    %c0_5 = arith.constant 0 : index
    %c0_6 = arith.constant 0 : index
    %17 = vector.load %arg2[%c0_5, %c0_6] : memref<1x64xf32, #tpu.memory_space<vmem>>, vector<1x64xf32>
    %18 = vector.broadcast %17 : vector<1x64xf32> to vector<16x64xf32>
    %19 = arith.mulf %16, %18 : vector<16x64xf32>
    %c0_7 = arith.constant 0 : index
    %c0_8 = arith.constant 0 : index
    %20 = vector.load %arg3[%c0_7, %c0_8] : memref<1x64xf32, #tpu.memory_space<vmem>>, vector<1x64xf32>
    %21 = vector.broadcast %20 : vector<1x64xf32> to vector<16x64xf32>
    %22 = arith.addf %19, %21 : vector<16x64xf32>
    %c0_9 = arith.constant 0 : index
    %c0_10 = arith.constant 0 : index
    %23 = vector.load %arg4[%c0_9, %c0_10] : memref<64x64xf32, #tpu.memory_space<vmem>>, vector<64x64xf32>
    %cst_11 = arith.constant dense<0.000000e+00> : vector<16x64xf32>
    %24 = tpu.matmul %22, %23, %cst_11 {dimension_numbers = #tpu.dot_dimension_numbers<[1], [0], [0], [1], [0, 0, 1, 1], [], []>} : vector<16x64xf32>, vector<64x64xf32>, vector<16x64xf32> -> vector<16x64xf32>
    %c0_12 = arith.constant 0 : index
    %c0_13 = arith.constant 0 : index
    %25 = vector.load %arg5[%c0_12, %c0_13] : memref<1x64xf32, #tpu.memory_space<vmem>>, vector<1x64xf32>
    %26 = vector.broadcast %25 : vector<1x64xf32> to vector<16x64xf32>
    %27 = arith.addf %24, %26 : vector<16x64xf32>
    %c0_14 = arith.constant 0 : index
    %c0_15 = arith.constant 0 : index
    %28 = vector.load %arg6[%c0_14, %c0_15] : memref<16x64xf32, #tpu.memory_space<vmem>>, vector<16x64xf32>
    tpu.vector_store %arg6[%c0_14, %c0_15], %27 {strides = array<i32>} : memref<16x64xf32, #tpu.memory_space<vmem>>, vector<16x64xf32>,
    return
  }
  func.func @transform_0(%arg0: i32) -> (i32, i32) {
    %c0_i32 = arith.constant 0 : i32
    %c0_i32_0 = arith.constant 0 : i32
    return %arg0, %c0_i32 : i32, i32
  }
  func.func @transform_1(%arg0: i32) -> (i32, i32) {
    %c0_i32 = arith.constant 0 : i32
    %c0_i32_0 = arith.constant 0 : i32
    %c0_i32_1 = arith.constant 0 : i32
    return %c0_i32, %c0_i32_0 : i32, i32
  }
  func.func @transform_2(%arg0: i32) -> (i32, i32) {
    %c0_i32 = arith.constant 0 : i32
    %c0_i32_0 = arith.constant 0 : i32
    %c0_i32_1 = arith.constant 0 : i32
    return %c0_i32, %c0_i32_0 : i32, i32
  }
  func.func @transform_3(%arg0: i32) -> (i32, i32) {
    %c0_i32 = arith.constant 0 : i32
    %c0_i32_0 = arith.constant 0 : i32
    %c0_i32_1 = arith.constant 0 : i32
    return %c0_i32, %c0_i32_0 : i32, i32
  }
  func.func @transform_4(%arg0: i32) -> (i32, i32) {
    %c0_i32 = arith.constant 0 : i32
    %c0_i32_0 = arith.constant 0 : i32
    %c0_i32_1 = arith.constant 0 : i32
    return %c0_i32, %c0_i32_0 : i32, i32
  }
  func.func @transform_5(%arg0: i32) -> (i32, i32) {
    %c0_i32 = arith.constant 0 : i32
    %c0_i32_0 = arith.constant 0 : i32
    return %arg0, %c0_i32 : i32, i32
  }
}

</mosaic_0001>

<bundles_post_ra>
// kernel: tpu_custom_call.1
= control target key start
LH: loop header
LB: loop body
LE: loop exit
PB: predicated region body
PF: predicated region fallthrough
CT: control target
= control target key end

     0   :  { %10 = vsyncpa [#allocation3], 0  ;;  %s400_s0 = inlined_call_operand.hbm [shape: f32[16,64], index: 0, kind: input, shape index: {}]   ;;  %s401_s1 = inlined_call_operand.hbm [shape: f32[1,64], index: 1, kind: input, shape index: {}]   ;;  %s402_s2 = inlined_call_operand.vmem [shape: f32[1,64], index: 2, kind: input, shape index: {}]   ;;  %s403_s3 = inlined_call_operand.hbm [shape: f32[64,64], index: 3, kind: input, shape index: {}]   ;;  %s404_s4 = inlined_call_operand.vmem [shape: f32[1,64], index: 4, kind: input, shape index: {}]   ;;  %s405_s5 = inlined_call_operand.hbm [shape: f32[16,64], index: 5, kind: output, shape index: {}]  }
   0x1   :  { %11 = vsyncpa [#allocation6], 0  ;;  %s31_s20 = sshll.u32 %s401_s1, 4  ;;  %s32_s20 = int_to_ptr.hbm [resolvable:$true] %s31_s20 }
   0x2   :  { %12 = vsyncpa [#allocation4], 0  ;;  %s323_s21 = smov [#allocation5]   ;;  %s17_s25 = sshll.u32 %s400_s0, 4  ;;  %s18_s25 = int_to_ptr.hbm [resolvable:$true] %s17_s25 }
   0x3   :  { %s33_s22 = sshll.u32 %s323_s21, 4  ;;  %s324_s26 = smov [#allocation2]   ;;  %s34_s22 = int_to_ptr.vmem [resolvable:$true] %s33_s22 }
   0x4   :  { %36 = dma.hbm_to_vmem [thread:$0]  %s32_s20, 16, %s34_s22, [#allocation6]  }
   0x5   :  { %s19_s27 = sshll.u32 %s324_s26, 4  ;;  %s325_s28 = smov 128   ;;  %s20_s27 = int_to_ptr.vmem [resolvable:$true] %s19_s27 }
   0x6   :  { %s326_s29 = smov 8   ;;  %s43_s6 = sshll.u32 %s403_s3, 4  ;;  %s44_s6 = int_to_ptr.hbm [resolvable:$true] %s43_s6 }
   0x7   :  { %25 = dma.hbm_to_vmem [thread:$0]  %s18_s25, 256, %s20_s27, [#allocation3], %s325_s28, %s325_s28, %s326_s29  }
   0x8   :  { %s327_s7 = smov [#allocation7]  }
   0x9   :  { %s45_s8 = sshll.u32 %s327_s7, 4  ;;  %s46_s8 = int_to_ptr.vmem [resolvable:$true] %s45_s8 }
   0xa   :  { %51 = dma.hbm_to_vmem [thread:$0]  %s44_s6, 1024, %s46_s8, [#allocation6], %s325_s28, %s325_s28, %s326_s29  }
   0xb   :  { %317 = dma.done.wait [#allocation3], 256  }
   0xc   :  { %318 = vsyncadd [#allocation3], 4294967040 }
   0xd   :  { %319 = dma.done.wait [#allocation6], 1040  }
   0xe   :  { %320 = vsyncadd [#allocation6], 4294966256  ;;  %vm68_vm0 = vcmask 523264   ;;  %v66_v0 = vld [vmem:[#allocation2] sm:$0xff]  ;;  %v67_v2 = vld [vmem:[#allocation2 + $0x8] sm:$0xff]  ;;  %v328_v4 = vmov 64.0  }
   0xf   :  { %v69_v1 = vsel %vm68_vm0, %v66_v0, 0.0  ;;  %v72_v3 = vsel %vm68_vm0, %v67_v2, 0.0  ;;  %215 = vrcp.f32 %v328_v4  ;;  %v139_v21 = vld [vmem:[#allocation7 + $0x38] sm:$0xff]  ;;  %v138_v22 = vld [vmem:[#allocation7 + $0x30] sm:$0xff]  ;;  %v137_v23 = vld [vmem:[#allocation7 + $0x28] sm:$0xff]  ;;  %s181_s14 = sshll.u32 %s405_s5, 4  ;;  %s182_s14 = int_to_ptr.hbm [resolvable:$true] %s181_s14 }
  0x10   :  { %70 = vadd.xlane.f32.xlu0 %v69_v1  ;;  %158 = vmatpush.msra.mxu0 %v139_v21  ;;  %v136_v24 = vld [vmem:[#allocation7 + $0x20] sm:$0xff]  ;;  %v135_v25 = vld [vmem:[#allocation7 + $0x18] sm:$0xff]  ;;  %v134_v26 = vld [vmem:[#allocation7 + $0x10] sm:$0xff] }
  0x11   :  { %197 = vmatpush.msra.mxu1 %v139_v21  ;;  %v133_v27 = vld [vmem:[#allocation7 + $0x8] sm:$0xff]  ;;  %v132_v28 = vld [vmem:[#allocation7] sm:$0xff]  ;;  %v212_v43 = vld [vmem:[#allocation5] ss:$0 sm:$0xff] }
  0x12   :  { %159 = vmatpush.msra.mxu0 %v138_v22  ;;  %v213_v47 = vld [vmem:[%s402_s2] ss:$0 sm:$0xff]  ;;  %s329_s2 = smov [#allocation8]  }
  0x13   :  { %198 = vmatpush.msra.mxu1 %v138_v22  ;;  %v214_v57 = vld [vmem:[%s404_s4] ss:$0 sm:$0xff]  ;;  %s179_s11 = sshll.u32 %s329_s2, 4  ;;  %s180_s11 = int_to_ptr.vmem [resolvable:$true] %s179_s11 }
  0x14   :  { %160 = vmatpush.msra.mxu0 %v137_v23 }
  0x15   :  { %v216_v5 = vpop.eup %215  ;;  %199 = vmatpush.msra.mxu1 %v137_v23 }
  0x16   :  { %v76_v6 = vmul.f32 64.0, %v216_v5  ;;  %vm80_vm1 = vweird.f32 %v216_v5  ;;  %161 = vmatpush.msra.mxu0 %v136_v24 }
  0x17   :  { %200 = vmatpush.msra.mxu1 %v136_v24 }
  0x18   :  { %73 = vadd.xlane.f32.xlu0 %v72_v3  ;;  %v77_v7 = vsub.f32 1.0, %v76_v6  ;;  %162 = vmatpush.msra.mxu0 %v135_v25 }
  0x19   :  { %201 = vmatpush.msra.mxu1 %v135_v25 }
  0x1a   :  { %v78_v8 = vmul.f32 %v216_v5, %v77_v7  ;;  %163 = vmatpush.msra.mxu0 %v134_v26 }
  0x1b   :  { %202 = vmatpush.msra.mxu1 %v134_v26 }
  0x1c   :  { %v79_v9 = vadd.f32 %v216_v5, %v78_v8  ;;  %164 = vmatpush.msra.mxu0 %v133_v27 }
  0x1d   :  { %203 = vmatpush.msra.mxu1 %v133_v27 }
  0x1e   :  { %v81_v10 = vsel %vm80_vm1, %v216_v5, %v79_v9  ;;  %165 = vmatpush.msra.mxu0 %v132_v28 }
  0x1f   :  { %204 = vmatpush.msra.mxu1 %v132_v28 }
  0x83   :  { %v71_v11 = vpop.xlane.xlu0 %70 }
  0x84   :  { %v82_v12 = vmul.f32 %v81_v10, %v71_v11 }
  0x86   :  { %v84_v13 = vsub.f32 %v66_v0, %v82_v12 }
  0x88   :  { %v86_v14 = vmul.f32 %v84_v13, %v84_v13 }
  0x8a   :  { %v88_v15 = vsel %vm68_vm0, %v86_v14, 0.0 }
  0x8b   :  { %89 = vadd.xlane.f32.xlu1 %v88_v15  ;;  %v74_v16 = vpop.xlane.xlu0 %73 }
  0x8c   :  { %v83_v17 = vmul.f32 %v81_v10, %v74_v16 }
  0x8e   :  { %v378_v18 = vsub.f32 %v67_v2, %v83_v17 }
  0x90   :  { %v87_v19 = vmul.f32 %v378_v18, %v378_v18 }
  0x92   :  { %v91_v20 = vsel %vm68_vm0, %v87_v19, 0.0 }
  0x93   :  { %92 = vadd.xlane.f32.xlu1 %v91_v20 }
  0xfe   :  { %v90_v29 = vpop.xlane.xlu1 %89 }
  0xff   :  { %v94_v30 = vmul.f32 %v90_v29, %v81_v10 }
 0x101   :  { %v96_v31 = vadd.f32 1e-05, %v94_v30 }
 0x103   :  { %217 = vrsqrt.f32 %v96_v31  ;;  %vm104_vm3 = vweird.f32 %v96_v31 }
 0x106   :  { %v93_v32 = vpop.xlane.xlu1 %92 }
 0x107   :  { %v95_v33 = vmul.f32 %v93_v32, %v81_v10 }
 0x109   :  { %v218_v34 = vpop.eup %217  ;;  %v97_v35 = vadd.f32 1e-05, %v95_v33 }
 0x10a   :  { %v99_v36 = vmul.f32 %v218_v34, %v96_v31  ;;  %vm105_vm2 = vweird.f32 %v218_v34 }
 0x10b   :  { %219 = vrsqrt.f32 %v97_v35  ;;  %vm106_vm4 = vmor %vm104_vm3, %vm105_vm2  ;;  %vm114_vm6 = vweird.f32 %v97_v35 }
 0x10c   :  { %v100_v37 = vmul.f32 %v218_v34, %v99_v36 }
 0x10e   :  { %v101_v38 = vmul.f32 0.5, %v100_v37 }
 0x110   :  { %v102_v39 = vsub.f32 1.5, %v101_v38 }
 0x111   :  { %v220_v40 = vpop.eup %219 }
 0x112   :  { %v103_v41 = vmul.f32 %v218_v34, %v102_v39  ;;  %v109_v42 = vmul.f32 %v220_v40, %v97_v35  ;;  %vm115_vm5 = vweird.f32 %v220_v40 }
 0x113   :  { %vm116_vm7 = vmor %vm114_vm6, %vm115_vm5 }
 0x114   :  { %v107_v44 = vsel %vm106_vm4, %v218_v34, %v103_v41  ;;  %v110_v45 = vmul.f32 %v220_v40, %v109_v42 }
 0x115   :  { %v118_v46 = vmul.f32 %v107_v44, %v84_v13 }
 0x116   :  { %v111_v48 = vmul.f32 0.5, %v110_v45 }
 0x117   :  { %v124_v49 = vmul.f32 %v212_v43, %v118_v46 }
 0x118   :  { %v112_v50 = vsub.f32 1.5, %v111_v48 }
 0x119   :  { %v130_v51 = vadd.f32 %v213_v47, %v124_v49 }
 0x11a   :  { %v113_v52 = vmul.f32 %v220_v40, %v112_v50 }
 0x11b   :  { %195 = vmatmul.msk.f32.vlgmr.msra.gmra.mxu0 %vm68_vm0, %v130_v51 }
 0x11c   :  { %v117_v53 = vsel %vm116_vm7, %v220_v40, %v113_v52 }
 0x11d   :  { %v119_v54 = vmul.f32 %v117_v53, %v378_v18 }
 0x11f   :  { %v125_v55 = vmul.f32 %v212_v43, %v119_v54 }
 0x121   :  { %v131_v56 = vadd.f32 %v213_v47, %v125_v55 }
 0x123   :  { %196 = vmatmul.msk.f32.vlgmr.msra.gmra.mxu1 %vm68_vm0, %v131_v56 }
 0x198   :  { %v167_v58 = vpop.f32.mrf.mxu0 }
 0x199   :  { %v168_v59 = vadd.f32 %v214_v57, %v167_v58 }
 0x19b   :  { %173 = vst.msk [vmem:[#allocation8] sm:$0xff] %vm68_vm0, %v168_v59 }
 0x1a0   :  { %v170_v60 = vpop.f32.mrf.mxu1 }
 0x1a1   :  { %v171_v61 = vadd.f32 %v214_v57, %v170_v60 }
 0x1a3   :  { %174 = vst.msk [vmem:[#allocation8 + $0x8] sm:$0xff] %vm68_vm0, %v171_v61 }
 0x1a4   :  { %187 = dma.vmem_to_hbm [thread:$0]  %s180_s11, 256, %s182_s14, [#allocation4], %s325_s28, %s325_s28, %s326_s29  }
 0x1a5   :  { %321 = dma.done.wait [#allocation4], 256  }
 0x1a6   :  { %322 = vsyncadd [#allocation4], 4294967040 }
 0x1a7   :  { %192 = vsyncpa [#allocation3], 1 }
 0x1a8   :  { %193 = vsyncpa [#allocation6], 1 }
 0x1a9   :  { %194 = vsyncpa [#allocation4], 1 }

</bundles_post_ra>
